<compile_context>
chip_gen: v7x
topology: tpu7x:2x2x1
jax: 0.10.0
libtpu: 0.0.40
codegen_flags: <defaults>
</compile_context>

<pallas_src>
import jax
import jax.numpy as jnp
from jax.experimental import pallas as pl
from jax.experimental.pallas import tpu as pltpu


def _token_select_kernel(th_ref, x_ref, out_ref):
    # th_ref : (1,)        f32, SMEM   -- sum(threshold) over the channel dim
    # x_ref  : (TM, G*C)   native dtype, VMEM
    # out_ref: (TM, G)     f32, VMEM
    tm, w = x_ref.shape
    g = out_ref.shape[-1]
    c = w // g
    th_sum = th_ref[0]
    # Cast AFTER the load: HBM traffic stays at native width, accumulation is f32.
    xa = jnp.abs(x_ref[...].astype(jnp.float32))
    if g == 1:
        s = jnp.sum(xa, axis=-1, keepdims=True)        # (TM, 1)
    else:
        s = jnp.sum(xa.reshape(tm, g, c), axis=-1)     # (TM, G)
    # mean(|x| - th, axis=-1) > 0  <=>  sum(|x|) > sum(th)
    out_ref[...] = (s > th_sum).astype(out_ref.dtype)


def token_select_gate(x, threshold):
    """x: (b, l, c) float; threshold: (1, 1, c). Returns (b, l, 1) float32 mask."""
    *lead, c = x.shape
    m = 1
    for d in lead:
        m *= d

    # Hoisted one-time O(C) threshold reduction -> one SMEM scalar.
    th_sum = jnp.sum(threshold.astype(jnp.float32)).reshape(1)

    # Lane-dense packing when C < 128: view x as (m/g, g*C) with g*C == 128.
    g = 1
    if c < 128 and 128 % c == 0 and m % (128 // c) == 0:
        g = 128 // c
    width = g * c
    m_rows = m // g
    x2d = x.reshape(m_rows, width)          # pure logical reshape, NATIVE dtype

    itemsize = jnp.dtype(x.dtype).itemsize
    sub = {4: 8, 2: 16, 1: 32}.get(itemsize, 8)   # min sublane multiple per dtype

    # Per-generation x-tile byte budget (double-buffered by the pipeline).
    kind = jax.devices()[0].device_kind.lower()
    if "v7" in kind:            # 64 MiB physical VMEM, 32 MiB scoped default
        tile_bytes, vmem_limit = 6 << 20, 32 << 20
    elif "v6" in kind:          # 128 MiB physical VMEM
        tile_bytes, vmem_limit = 8 << 20, 64 << 20
    else:                       # v5e / v5p / v4 / default
        tile_bytes, vmem_limit = 4 << 20, 32 << 20

    row_bytes = max(width * itemsize, 1)
    tm = max(sub, (tile_bytes // row_bytes) // sub * sub)
    if tm >= m_rows:
        tm = m_rows             # single full-extent block (also covers m_rows < sub)
    grid = (pl.cdiv(m_rows, tm),)   # last block may overhang: rows independent,
                                    # OOB output rows masked -- no jnp.pad pass.

    def _call(semantics):
        return pl.pallas_call(
            _token_select_kernel,
            out_shape=jax.ShapeDtypeStruct((m_rows, g), jnp.float32),
            grid=grid,
            in_specs=[
                pl.BlockSpec(memory_space=pltpu.MemorySpace.SMEM),   # th_sum scalar
                pl.BlockSpec((tm, width), lambda i: (i, 0)),          # x row tile
            ],
            out_specs=pl.BlockSpec((tm, g), lambda i: (i, 0)),
            compiler_params=pltpu.CompilerParams(
                dimension_semantics=(semantics,),
                vmem_limit_bytes=vmem_limit,
            ),
            cost_estimate=pl.CostEstimate(
                flops=2 * m * c,
                transcendentals=0,
                bytes_accessed=m * c * itemsize + m * 4 + 4,
            ),
        )(th_sum, x2d)

    # v7x: split the row axis across both TensorCores when there are >= 2 blocks.
    if "v7" in kind and grid[0] >= 2:
        try:
            return _call(pltpu.CORE_PARALLEL).reshape(*lead, 1)
        except Exception:
            pass   # conservative fallback if CORE_PARALLEL is rejected
    return _call("parallel").reshape(*lead, 1)


def reference(x, threshold):
    # Exact PyTorch order of operations (f32 accumulation).
    s = (jnp.abs(x.astype(jnp.float32)) - threshold.astype(jnp.float32)).mean(
        axis=2, keepdims=True)
    return (s > 0.0).astype(jnp.float32)


if __name__ == "__main__":
    key = jax.random.PRNGKey(0)
    k1, k2, k3, k4 = jax.random.split(key, 4)

    # Case 1: f32 input, zero threshold (module __init__ state), packed path (c < 128).
    b, l, c = 2, 8, 32
    x = jax.random.normal(k1, (b, l, c), dtype=jnp.float32)
    th = jnp.zeros((1, 1, c), dtype=jnp.float32)
    out = token_select_gate(x, th)
    jax.block_until_ready(out)
    assert out.shape == (b, l, 1)
    assert jnp.allclose(out, reference(x, th)), "case1 mismatch"

    # Case 2: bf16 input (native-dtype streaming), nonzero threshold, packed path.
    x = jax.random.normal(k2, (b, l, c), dtype=jnp.float32).astype(jnp.bfloat16)
    th = jnp.full((1, 1, c), 0.5, dtype=jnp.float32)
    out = token_select_gate(x, th)
    jax.block_until_ready(out)
    assert out.shape == (b, l, 1)
    assert jnp.allclose(out, reference(x, th)), "case2 mismatch"

    # Case 3: bf16 input, wide channel dim (c >= 128) -> unpacked path.
    c3 = 512
    x = jax.random.normal(k3, (b, l, c3), dtype=jnp.float32).astype(jnp.bfloat16)
    th = jnp.full((1, 1, c3), 0.25, dtype=jnp.float32)
    out = token_select_gate(x, th)
    jax.block_until_ready(out)
    assert out.shape == (b, l, 1)
    assert jnp.allclose(out, reference(x, th)), "case3 mismatch"

    # Case 4: f32, row count not divisible by the packing factor -> narrow-lane fallback.
    b4, l4, c4 = 3, 7, 32
    x = jax.random.normal(k4, (b4, l4, c4), dtype=jnp.float32)
    th = jnp.full((1, 1, c4), 0.5, dtype=jnp.float32)
    out = token_select_gate(x, th)
    jax.block_until_ready(out)
    assert out.shape == (b4, l4, 1)
    assert jnp.allclose(out, reference(x, th)), "case4 mismatch"

    # TODO(synk): BinaryStep's custom backward (STE surrogate gradient) is
    # backward-only and not part of this forward kernel.
    print("KERNEL_OK")
</pallas_src>

<mosaic_0001>
module attributes {stable_mosaic.version = 11 : i64} {
  func.func @_token_select_kernel(%arg0: i32, %arg1: memref<1xf32, #tpu.memory_space<smem>>, %arg2: memref<4x128xf32, #tpu.memory_space<vmem>>, %arg3: memref<4x4xf32, #tpu.memory_space<vmem>>) attributes {dimension_semantics = [#tpu.dimension_semantics<parallel>], iteration_bounds = array<i64: 1>, scalar_prefetch = 0 : i64, scratch_operands = 0 : i64, tpu.core_type = #tpu.core_type<tc>, window_params = [{transform_indices = @transform_0, window_bounds = array<i64: 1>}, {transform_indices = @transform_1, window_bounds = array<i64: 4, 128>}, {transform_indices = @transform_2, window_bounds = array<i64: 4, 4>}]} {
    %c0 = arith.constant 0 : index
    %0 = memref.load %arg1[%c0] : memref<1xf32, #tpu.memory_space<smem>>
    %c0_0 = arith.constant 0 : index
    %c0_1 = arith.constant 0 : index
    %1 = vector.load %arg2[%c0_0, %c0_1] : memref<4x128xf32, #tpu.memory_space<vmem>>, vector<4x128xf32>
    %2 = math.absf %1 : vector<4x128xf32>
    %3 = vector.shape_cast %2 : vector<4x128xf32> to vector<4x4x32xf32>
    %cst = arith.constant dense<0.000000e+00> : vector<4x4xf32>
    %4 = vector.multi_reduction <add>, %3, %cst [2] : vector<4x4x32xf32> to vector<4x4xf32>
    %5 = vector.broadcast %0 : f32 to vector<4x4xf32>
    %6 = arith.cmpf ogt, %4, %5 : vector<4x4xf32>
    %7 = arith.extui %6 : vector<4x4xi1> to vector<4x4xi32>
    %8 = arith.sitofp %7 : vector<4x4xi32> to vector<4x4xf32>
    %c0_2 = arith.constant 0 : index
    %c0_3 = arith.constant 0 : index
    %9 = vector.load %arg3[%c0_2, %c0_3] : memref<4x4xf32, #tpu.memory_space<vmem>>, vector<4x4xf32>
    tpu.vector_store %arg3[%c0_2, %c0_3], %8 {strides = array<i32>} : memref<4x4xf32, #tpu.memory_space<vmem>>, vector<4x4xf32>,
    return
  }
  func.func @transform_0(%arg0: i32) -> i32 {
    %c0_i32 = arith.constant 0 : i32
    %c0_i32_0 = arith.constant 0 : i32
    return %c0_i32 : i32
  }
  func.func @transform_1(%arg0: i32) -> (i32, i32) {
    %c0_i32 = arith.constant 0 : i32
    %c0_i32_0 = arith.constant 0 : i32
    return %arg0, %c0_i32 : i32, i32
  }
  func.func @transform_2(%arg0: i32) -> (i32, i32) {
    %c0_i32 = arith.constant 0 : i32
    %c0_i32_0 = arith.constant 0 : i32
    return %arg0, %c0_i32 : i32, i32
  }
}

</mosaic_0001>

<bundles_post_ra>
// kernel: tpu_custom_call.1
= control target key start
LH: loop header
LB: loop body
LE: loop exit
PB: predicated region body
PF: predicated region fallthrough
CT: control target
= control target key end

     0   :  { %8 = vsyncpa [#allocation4], 0  ;;  %s254_s0 = inlined_call_operand.<no memory space> [shape: f32[1], index: 0, kind: input, shape index: {}]   ;;  %s255_s1 = inlined_call_operand.hbm [shape: f32[4,128], index: 1, kind: input, shape index: {}]   ;;  %s256_s2 = inlined_call_operand.hbm [shape: f32[4,4], index: 2, kind: output, shape index: {}]  }
   0x1   :  { %9 = vsyncpa [#allocation5], 0  ;;  %s204_s9 = smov [#allocation3]   ;;  %s156_s13 = scalar_lea.hbm %s255_s1, 64 }
   0x2   :  { %s18_s10 = sshll.u32 %s204_s9, 4  ;;  %p157_p0 = scmp.ne.s32.totalorder %s255_s1, %s156_s13  ;;  %s19_s10 = int_to_ptr.vmem [resolvable:$true] %s18_s10 }
   0x3   :  { %p160_p1 = scmp.lt.u32.totalorder %s156_s13, %s255_s1 }
   0x5   :  { %p162_p2 = pnand %p160_p1, %p157_p0 }
   0x7   :  { %165 = shalt.err (!%p162_p2)
}
   0x8   :  { %s166_s18 = scalar_lea.vmem %s19_s10, 64  ;;  %p171_p4 = scmp.lt.s32.totalorder %s19_s10, %s19_s10 }
   0x9   :  { %p167_p3 = scmp.ne.s32.totalorder %s19_s10, %s166_s18  ;;  %p172_p5 = scmp.lt.s32.totalorder %s166_s18, %s166_s18 }
   0xb   :  { %p173_p6 = por %p172_p5, %p171_p4 }
   0xd   :  { %p174_p7 = pnand %p173_p6, %p167_p3 }
   0xf   :  { %177 = shalt.err (!%p174_p7)
}
  0x10   :  { %21 = dma.hbm_to_vmem [thread:$0]  %s255_s1, 64, %s19_s10, [#allocation4]  }
  0x11   :  { %200 = dma.done.wait [#allocation4], 64  }
  0x12   :  { %201 = vsyncadd [#allocation4], 4294967232  ;;  %v26_v0 = vld [vmem:[#allocation3] sm:$0xf]  ;;  %s205_s21 = smov 32   ;;  %s206_s22 = smov 96   ;;  %v42_v2 = vlaneseq  ;;  %v85_v32 = vstv %s254_s0 }
  0x13   :  { %v27_v1 = vand.u32 2147483647, %v26_v0  ;;  %s207_s23 = smov 64   ;;  %v208_v6 = vmov 1983009808   ;;  %vm72_vm0 = vcmask 257024  }
  0x14   :  { %v43_v3 = vshrl.u32 %v42_v2, 7  ;;  %v103_v4 = vand.u32 127, %v42_v2  ;;  %v40_v7 = vunpack.c.l.s4 %v208_v6  ;;  %v209_v9 = vmov 1934713408   ;;  %s211_s25 = smov [#allocation6]  }
  0x15   :  { %35 = vrot.lane.b32.xlu1 %v27_v1, %s205_s21  ;;  %29 = vrot.lane.b32.xlu0 %v27_v1, %s206_s22  ;;  %v57_v10 = vunpack.c.l.s4 %v209_v9  ;;  %v210_v26 = vmov 0.0   ;;  %vm120_vm4 = vcmask 1041409   ;;  %vm122_vm6 = vcmask 1042434   ;;  %s135_s26 = sshll.u32 %s211_s25, 4  ;;  %s136_s26 = int_to_ptr.vmem [resolvable:$true] %s135_s26 }
  0x16   :  { %v106_v5 = vsub.s32 %v103_v4, %v43_v3  ;;  %v41_v8 = vunpack.c.0.s8 %v40_v7  ;;  %vm124_vm7 = vcmask 1043459   ;;  %vm127_vm8 = vcmask 27648   ;;  %s178_s0 = scalar_lea.vmem %s136_s26, 64  ;;  %p183_p9 = scmp.lt.s32.totalorder %s136_s26, %s136_s26 }
  0x17   :  { %v58_v15 = vunpack.c.0.s8 %v57_v10  ;;  %p179_p8 = scmp.ne.s32.totalorder %s136_s26, %s178_s0  ;;  %p184_p10 = scmp.lt.s32.totalorder %s178_s0, %s178_s0 }
  0x18   :  { %v44_v13 = vsub.s32 %v41_v8, %v43_v3 }
  0x19   :  { %32 = vrot.lane.b32.xlu0 %v27_v1, %s207_s23  ;;  %v61_v20 = vsub.s32 %v58_v15, %v43_v3  ;;  %p185_p11 = por %p184_p10, %p183_p9 }
  0x1b   :  { %p186_p12 = pnand %p185_p11, %p179_p8 }
  0x87   :  { %v36_v11 = vpop.permute.xlu1 %35  ;;  %v30_v12 = vpop.permute.xlu0 %29 }
  0x88   :  { %v46_v14 = vcombine.low %v30_v12, %v36_v11 }
  0x8a   :  { %v53_v18 = vrot.slane %v46_v14, %v44_v13 }
  0x8b   :  { %v33_v16 = vpop.permute.xlu0 %32 }
  0x8c   :  { %v38_v17 = vcombine.low %v27_v1, %v33_v16 }
  0x8e   :  { %v45_v19 = vrot.slane %v38_v17, %v44_v13 }
  0x90   :  { %v55_v21 = vcombine.high %v45_v19, %v53_v18  ;;  %v54_v22 = vcombine.low %v45_v19, %v53_v18 }
  0x92   :  { %v62_v23 = vrot.slane %v54_v22, %v61_v20  ;;  %v69_v24 = vrot.slane %v55_v21, %v61_v20 }
  0x94   :  { %v73_v25 = vsel %vm72_vm0, %v62_v23, 0.0  ;;  %v70_v27 = vcombine.high %v62_v23, %v210_v26  ;;  %v71_v28 = vcombine.high %v69_v24, %v210_v26  ;;  %v79_v31 = vsel %vm72_vm0, %v69_v24, 0.0 }
  0x95   :  { %74 = vadd.xlane.f32.xlu1 %v73_v25 }
  0x96   :  { %v76_v29 = vsel %vm72_vm0, %v70_v27, 0.0  ;;  %v82_v30 = vsel %vm72_vm0, %v71_v28, 0.0 }
  0x97   :  { %77 = vadd.xlane.f32.xlu0 %v76_v29 }
  0x99   :  { %83 = vadd.xlane.f32.xlu1 %v82_v30 }
  0x9b   :  { %80 = vadd.xlane.f32.xlu0 %v79_v31 }
 0x122   :  { %v75_v33 = vpop.xlane.xlu1 %74 }
 0x123   :  { %vm86_vm1 = vcmp.gt.f32.partialorder %v75_v33, %v85_v32 }
 0x124   :  { %v78_v34 = vpop.xlane.xlu0 %77  ;;  %v144_v37 = vsel %vm86_vm1, 1.0, %v210_v26 }
 0x125   :  { %vm87_vm2 = vcmp.gt.f32.partialorder %v78_v34, %v85_v32  ;;  %v107_v41 = vrot.slane %v144_v37, %v106_v5 }
 0x126   :  { %v145_v35 = vsel %vm87_vm2, 1.0, %v210_v26  ;;  %v84_v36 = vpop.xlane.xlu1 %83 }
 0x127   :  { %vm89_vm3 = vcmp.gt.f32.partialorder %v84_v36, %v85_v32  ;;  %v111_v38 = vrot.slane %v145_v35, %v106_v5 }
 0x128   :  { %v81_v39 = vpop.xlane.xlu0 %80  ;;  %v147_v40 = vsel %vm89_vm3, 1.0, %v210_v26 }
 0x129   :  { %vm88_vm5 = vcmp.gt.f32.partialorder %v81_v39, %v85_v32  ;;  %v121_v44 = vsel %vm120_vm4, %v111_v38, %v107_v41  ;;  %v119_v45 = vrot.slane %v147_v40, %v106_v5 }
 0x12a   :  { %v146_v42 = vsel %vm88_vm5, 1.0, %v210_v26 }
 0x12b   :  { %v115_v43 = vrot.slane %v146_v42, %v106_v5 }
 0x12d   :  { %v123_v46 = vsel %vm122_vm6, %v115_v43, %v121_v44 }
 0x12e   :  { %v125_v47 = vsel %vm124_vm7, %v119_v45, %v123_v46 }
 0x12f   :  { %128 = vst.msk [vmem:[#allocation6] sm:$0xf] %vm127_vm8, %v125_v47 }
 0x130   :  { %189 = shalt.err (!%p186_p12)
}
 0x131   :  { %s190_s29 = scalar_lea.hbm %s256_s2, 64 }
 0x132   :  { %p191_p13 = scmp.ne.s32.totalorder %s256_s2, %s190_s29  ;;  %p194_p0 = scmp.lt.u32.totalorder %s190_s29, %s256_s2 }
 0x134   :  { %p196_p1 = pnand %p194_p0, %p191_p13 }
 0x136   :  { %199 = shalt.err (!%p196_p1)
}
 0x137   :  { %138 = dma.vmem_to_hbm [thread:$0]  %s136_s26, 64, %s256_s2, [#allocation5]  }
 0x138   :  { %202 = dma.done.wait [#allocation5], 64  }
 0x139   :  { %203 = vsyncadd [#allocation5], 4294967232 }
 0x13a   :  { %142 = vsyncpa [#allocation4], 1 }
 0x13b   :  { %143 = vsyncpa [#allocation5], 1 }

</bundles_post_ra>
